<compile_context>
chip_gen: v7x
topology: tpu7x:2x2x1
jax: 0.10.0
libtpu: 0.0.40
codegen_flags: <defaults>
</compile_context>

<pallas_src>
import functools

import jax
import jax.numpy as jnp
import numpy as np
from jax import lax
from jax.experimental import pallas as pl
from jax.experimental.pallas import tpu as pltpu

_NORM_EPS = 1e-12  # matches torch.nn.functional.normalize default eps


def _round_up(x: int, m: int) -> int:
    return ((x + m - 1) // m) * m


# ---------------------------------------------------------------------------
# Stage 1: row-wise L2 normalization (F.normalize, dim=1)
# ---------------------------------------------------------------------------
def _l2_normalize_kernel(x_ref, o_ref):
    x = x_ref[...]
    nrm = jnp.sqrt(jnp.sum(x * x, axis=-1, keepdims=True))
    o_ref[...] = x / jnp.maximum(nrm, _NORM_EPS)


def _l2_normalize(x, bm: int):
    n_pad, d = x.shape
    return pl.pallas_call(
        _l2_normalize_kernel,
        out_shape=jax.ShapeDtypeStruct((n_pad, d), jnp.float32),
        grid=(n_pad // bm,),
        in_specs=[pl.BlockSpec((bm, d), lambda i: (i, 0))],
        out_specs=pl.BlockSpec((bm, d), lambda i: (i, 0)),
        compiler_params=pltpu.CompilerParams(dimension_semantics=("parallel",)),
    )(x)


# ---------------------------------------------------------------------------
# Stage 2: tiled InfoNCE reduction
# ---------------------------------------------------------------------------
def _mi_loss_kernel(n1r_ref, n2r_ref, n1c_ref, n2c_ref, loss_ref,
                    s12_ref, s11_ref, s21_ref, s22_ref,
                    *, inv_tau: float, n_valid: int, bn: int):
    j = pl.program_id(1)

    @pl.when(j == 0)
    def _init():
        s12_ref[...] = jnp.zeros_like(s12_ref)
        s11_ref[...] = jnp.zeros_like(s11_ref)
        s21_ref[...] = jnp.zeros_like(s21_ref)
        s22_ref[...] = jnp.zeros_like(s22_ref)

    n1r = n1r_ref[...]   # (bm, d) normalized rows of view 1
    n2r = n2r_ref[...]   # (bm, d) normalized rows of view 2
    n1c = n1c_ref[...]   # (bn, d) normalized cols of view 1
    n2c = n2c_ref[...]   # (bn, d) normalized cols of view 2

    # Mask out columns that are zero-padding added by the wrapper.
    col_ids = j * bn + lax.broadcasted_iota(jnp.int32, (1, bn), 1)
    col_mask = (col_ids < n_valid).astype(jnp.float32)   # (1, bn)

    def exp_rowsum(a, b):
        # a @ b.T via dot_general (no explicit transpose -> native MXU "nt").
        s = lax.dot_general(a, b, (((1,), (1,)), ((), ())),
                            preferred_element_type=jnp.float32)      # (bm, bn)
        return jnp.sum(jnp.exp(s * inv_tau) * col_mask,
                       axis=-1, keepdims=True)                       # (bm, 1)

    s12_ref[...] += exp_rowsum(n1r, n2c)
    s11_ref[...] += exp_rowsum(n1r, n1c)
    s21_ref[...] += exp_rowsum(n2r, n1c)
    s22_ref[...] += exp_rowsum(n2r, n2c)

    @pl.when(j == pl.num_programs(1) - 1)
    def _finalize():
        pos = jnp.exp(jnp.sum(n1r * n2r, axis=-1, keepdims=True) * inv_tau)
        d11 = jnp.exp(jnp.sum(n1r * n1r, axis=-1, keepdims=True) * inv_tau)
        d22 = jnp.exp(jnp.sum(n2r * n2r, axis=-1, keepdims=True) * inv_tau)
        l1 = -jnp.log(pos / (s12_ref[...] + s11_ref[...] - d11))
        l2 = -jnp.log(pos / (s21_ref[...] + s22_ref[...] - d22))
        loss_ref[...] = 0.5 * (l1 + l2)


def mutual_info_loss(y1, y2, tau: float = 0.5, *, block_rows: int = 256):
    """Pallas implementation of MutualInfoLoss.forward (projection_head=False)."""
    if y1.ndim != 2 or y1.shape != y2.shape:
        raise ValueError("y1 and y2 must both be (2b, d) with identical shapes")
    n, d = y1.shape
    tau = float(tau)              # static Python scalar — never traced/baked wrongly
    inv_tau = 1.0 / tau

    y1 = jnp.asarray(y1, jnp.float32)
    y2 = jnp.asarray(y2, jnp.float32)

    # Tile size along rows (== along columns); pad rows so tiles divide evenly.
    bm = _round_up(int(min(block_rows, _round_up(n, 8))), 8)
    n_pad = _round_up(n, bm)
    if n_pad != n:
        pad = ((0, n_pad - n), (0, 0))
        y1 = jnp.pad(y1, pad)
        y2 = jnp.pad(y2, pad)

    # Stage 1: normalize once (lane-dense over d).
    n1 = _l2_normalize(y1, bm)
    n2 = _l2_normalize(y2, bm)

    # Stage 2: tiled similarity / InfoNCE reduction.
    grid = (n_pad // bm, n_pad // bm)
    kernel = functools.partial(_mi_loss_kernel, inv_tau=inv_tau,
                               n_valid=n, bn=bm)
    row_spec = pl.BlockSpec((bm, d), lambda i, j: (i, 0))
    col_spec = pl.BlockSpec((bm, d), lambda i, j: (j, 0))

    per_row = pl.pallas_call(
        kernel,
        out_shape=jax.ShapeDtypeStruct((n_pad, 1), jnp.float32),
        grid_spec=pltpu.PrefetchScalarGridSpec(
            num_scalar_prefetch=0,
            grid=grid,
            in_specs=[row_spec, row_spec, col_spec, col_spec],
            out_specs=pl.BlockSpec((bm, 1), lambda i, j: (i, 0)),
            scratch_shapes=[pltpu.VMEM((bm, 1), jnp.float32)] * 4,
        ),
        compiler_params=pltpu.CompilerParams(
            dimension_semantics=("parallel", "arbitrary")),
    )(n1, n2, n1, n2)

    # Final tiny reduction (mean over valid rows) done outside the kernel.
    return jnp.mean(per_row[:n, 0])


class MutualInfoLoss:
    """JAX/Pallas port of the PyTorch MutualInfoLoss module (forward only)."""

    def __init__(self, tau, out_channels=None, projection_channels=None,
                 projection_head: bool = False, bias: bool = True,
                 structure: str = "GRACE"):
        if projection_head:
            # TODO(synk): ProjectionHead not ported (module default is projection_head=False).
            raise NotImplementedError("projection_head=True is not supported")
        self.tau = float(tau)

    def __call__(self, y_1, y_2):
        return mutual_info_loss(y_1, y_2, tau=self.tau)


# ---------------------------------------------------------------------------
# Pure-JAX reference (mirrors the PyTorch forward exactly)
# ---------------------------------------------------------------------------
def mutual_info_loss_ref(y1, y2, tau):
    y1 = jnp.asarray(y1, jnp.float32)
    y2 = jnp.asarray(y2, jnp.float32)

    def normalize(x):
        nrm = jnp.sqrt(jnp.sum(x * x, axis=-1, keepdims=True))
        return x / jnp.maximum(nrm, _NORM_EPS)

    z1, z2 = normalize(y1), normalize(y2)
    f = lambda s: jnp.exp(s / tau)

    def pairwise(a, b):
        pos = f(a @ b.T)
        neg = f(a @ a.T)
        return -jnp.log(jnp.diag(pos) /
                        (pos.sum(1) + neg.sum(1) - jnp.diag(neg)))

    l1 = pairwise(z1, z2)
    l2 = pairwise(z2, z1)
    return jnp.mean(0.5 * (l1 + l2))


if __name__ == "__main__":
    key = jax.random.PRNGKey(0)
    k1, k2, k3, k4 = jax.random.split(key, 4)
    tau = 0.5

    # Case 1: batch b=8 -> 2b=16 global embeddings, d=128 (exercises 2x2 grid).
    y1 = jax.random.normal(k1, (16, 128), dtype=jnp.float32)
    y2 = jax.random.normal(k2, (16, 128), dtype=jnp.float32)
    loss = jax.block_until_ready(mutual_info_loss(y1, y2, tau, block_rows=8))
    ref = mutual_info_loss_ref(y1, y2, tau)
    np.testing.assert_allclose(np.asarray(loss), np.asarray(ref),
                               rtol=1e-5, atol=1e-5)

    # Case 2: ragged row count / non-128 d (exercises padding + column mask).
    y1b = jax.random.normal(k3, (10, 64), dtype=jnp.float32)
    y2b = jax.random.normal(k4, (10, 64), dtype=jnp.float32)
    lossb = jax.block_until_ready(mutual_info_loss(y1b, y2b, tau, block_rows=8))
    refb = mutual_info_loss_ref(y1b, y2b, tau)
    np.testing.assert_allclose(np.asarray(lossb), np.asarray(refb),
                               rtol=1e-5, atol=1e-5)

    # Module-style API.
    loss_mod = MutualInfoLoss(tau)(y1, y2)
    jax.block_until_ready(loss_mod)

    print("KERNEL_OK")
</pallas_src>

<mosaic_0001>
module attributes {stable_mosaic.version = 11 : i64} {
  func.func @_l2_normalize_kernel(%arg0: i32, %arg1: memref<8x128xf32, #tpu.memory_space<vmem>>, %arg2: memref<8x128xf32, #tpu.memory_space<vmem>>) attributes {dimension_semantics = [#tpu.dimension_semantics<parallel>], iteration_bounds = array<i64: 2>, scalar_prefetch = 0 : i64, scratch_operands = 0 : i64, tpu.core_type = #tpu.core_type<tc>, window_params = [{transform_indices = @transform_0, window_bounds = array<i64: 8, 128>}, {transform_indices = @transform_1, window_bounds = array<i64: 8, 128>}]} {
    %c0 = arith.constant 0 : index
    %c0_0 = arith.constant 0 : index
    %0 = vector.load %arg1[%c0, %c0_0] : memref<8x128xf32, #tpu.memory_space<vmem>>, vector<8x128xf32>
    %1 = arith.mulf %0, %0 : vector<8x128xf32>
    %cst = arith.constant dense<0.000000e+00> : vector<8xf32>
    %2 = vector.multi_reduction <add>, %1, %cst [1] : vector<8x128xf32> to vector<8xf32>
    %3 = vector.shape_cast %2 : vector<8xf32> to vector<8x1xf32>
    %4 = math.sqrt %3 : vector<8x1xf32>
    %cst_1 = arith.constant 9.99999996E-13 : f32
    %5 = vector.broadcast %cst_1 : f32 to vector<8x1xf32>
    %6 = arith.maximumf %4, %5 : vector<8x1xf32>
    %7 = vector.broadcast %6 : vector<8x1xf32> to vector<8x128xf32>
    %8 = arith.divf %0, %7 : vector<8x128xf32>
    %c0_2 = arith.constant 0 : index
    %c0_3 = arith.constant 0 : index
    %9 = vector.load %arg2[%c0_2, %c0_3] : memref<8x128xf32, #tpu.memory_space<vmem>>, vector<8x128xf32>
    tpu.vector_store %arg2[%c0_2, %c0_3], %8 {strides = array<i32>} : memref<8x128xf32, #tpu.memory_space<vmem>>, vector<8x128xf32>,
    return
  }
  func.func @transform_0(%arg0: i32) -> (i32, i32) {
    %c0_i32 = arith.constant 0 : i32
    %c0_i32_0 = arith.constant 0 : i32
    return %arg0, %c0_i32 : i32, i32
  }
  func.func @transform_1(%arg0: i32) -> (i32, i32) {
    %c0_i32 = arith.constant 0 : i32
    %c0_i32_0 = arith.constant 0 : i32
    return %arg0, %c0_i32 : i32, i32
  }
}

</mosaic_0001>

<bundles_post_ra>
// kernel: tpu_custom_call.1
= control target key start
LH: loop header
LB: loop body
LE: loop exit
PB: predicated region body
PF: predicated region fallthrough
CT: control target
= control target key end

     0   :  { %6 = vsyncpa [#allocation3], 0  ;;  %s564_s0 = inlined_call_operand.hbm [shape: f32[16,128], index: 0, kind: input, shape index: {}]   ;;  %s565_s1 = inlined_call_operand.hbm [shape: f32[16,128], index: 1, kind: output, shape index: {}]  }
   0x1   :  { %8 = vsyncpa [#allocation3 + $0x1], 0 }
   0x2   :  { %9 = vsyncpa [#allocation4], 0 }
   0x3   :  { %11 = vsyncpa [#allocation4 + $0x1], 0  ;;  %s403_s6 = smov 0   ;;  %s405_s7 = smov 0  }
   0x4   :  { %s407_s8 = smov 0   ;;  %s409_s9 = smov 0  }
   0x5 LB: > { %s424_s10 = sadd.s32 4294967295, %s389_s9   ;;  %s231_s11 = sadd.s32 4294967294, %s389_s9   ;;  %s389_s9 = sphi %s409_s9, %s580_s9   ;;  %s385_s8 = sphi %s407_s8, %s579_s8   ;;  %s381_s7 = sphi %s405_s7, %s578_s7   ;;  %s377_s6 = sphi %s403_s6, %s577_s6  }
   0x6   : > { %s428_s12 = sadd.s32 1, %s389_s9   ;;  %s24_s13 = sadd.s32 1, %s385_s8 }
   0x7   : > { %s21_s14 = ssub.s32 %s389_s9, %s428_s12  ;;  %p31_p0 = scmp.ne.s32.totalorder %s385_s8, %s381_s7 }
   0x8   : > { %p22_p1 = scmp.eq.s32.totalorder %s21_s14, 0  ;;  %p32_p2 = scmp.eq.s32.totalorder %s389_s9, 0 }
   0x9   : > { %p37_p3 = scmp.ne.s32.totalorder %s381_s7, %s377_s6  ;;  %p38_p4 = scmp.eq.s32.totalorder %s424_s10, 0 }
   0xa   : > { %s440_s15 = scalar_select %p22_p1, %s385_s8, %s24_s13  }
   0xb   : > { %p442_p5 = por %p32_p2, %p31_p0  ;;  %p446_p6 = por %p38_p4, %p37_p3 }
   0xc   : > { %p61_p7 = scmp.eq.s32.totalorder %s424_s10, 1  ;;  %p67_p8 = scmp.eq.s32.totalorder %s231_s11, 1 }
   0xd   : > { %p255_p10 = scmp.lt.s32.totalorder %s389_s9, 2  ;;  %s87_s20 = sand.u32 1, %s385_s8  }
   0xe   : > { %p453_p11 = por %p61_p7, %p31_p0  ;;  %p457_p12 = por %p67_p8, %p37_p3 }
   0xf   : > { %s235_s21 = sshll.u32 %s389_s9, 7  ;;  %s234_s22 = sshll.u32 %s87_s20, 3 }
  0x10   : > { %s569_s18 = scalar_select %p453_p11, 1, 0 }
  0x11   : > { %s570_s19 = scalar_select %p457_p12, 1, 0 }
  0x12   : > { %s466_s25 = scalar_lea.hbm %s564_s0, %s235_s21  ;;  %s91_s26 = scalar_lea.vmem [#allocation2], %s234_s22 }
  0x13   : > { %s98_s27 = sshll.u32 %s91_s26, 4  ;;  %p470_p13 = pnand %p255_p10, %p442_p5  ;;  %s474_s27 = int_to_ptr.vmem [resolvable:$true] %s98_s27 }
  0x14   : > { %s88_s29 = scalar_lea.sflag [#allocation3], %s87_s20  ;;  %s293_s30 = scalar_lea.hbm %s466_s25, 128 }
  0x15   : > { %p294_p2 = scmp.ne.s32.totalorder %s466_s25, %s293_s30  ;;  %p295_p3 = pneg %p470_p13 }
  0x16   : > { %s298_s4 = scalar_lea.hbm %s564_s0, 256  ;;  %p299_p5 = scmp.lt.u32.totalorder %s466_s25, %s564_s0 }
  0x17   : > { %p296_p4 = pnand %p295_p3, %p294_p2  ;;  %p300_p8 = scmp.lt.u32.totalorder %s298_s4, %s293_s30 }
  0x18   : > { %p302_p9 = scmp.lt.u32.totalorder %s293_s30, %s466_s25 }
  0x19   : > { %p297_p7 = pneg %p296_p4  ;;  %p301_p10 = por %p300_p8, %p299_p5 }
  0x1b   : > { %p303_p0 = por %p302_p9, %p301_p10 }
  0x1d   : > { %p304_p1 = pnand %p303_p0, %p297_p7 }
  0x1f   : > { %307 = shalt.err (!%p304_p1)
}
  0x20   : > { %s308_s13 = scalar_lea.vmem %s474_s27, 128  ;;  %s391_s14 = smov [#allocation2]  }
  0x21   : > { %p309_p2 = scmp.ne.s32.totalorder %s474_s27, %s308_s13  ;;  %s313_s16 = sshll.u32 %s391_s14, 4  ;;  %s314_s16 = int_to_ptr.vmem [resolvable:$false] %s313_s16 }
  0x22   : > { %s315_s20 = scalar_lea.vmem %s314_s16, 256  ;;  %p316_p11 = scmp.lt.s32.totalorder %s474_s27, %s314_s16 }
  0x23   : > { %p311_p4 = pnand %p309_p2, %p295_p3  ;;  %p317_p5 = scmp.lt.s32.totalorder %s315_s20, %s308_s13 }
  0x25   : > { %p312_p12 = pneg %p311_p4  ;;  %p318_p8 = por %p317_p5, %p316_p11 }
  0x27   : > { %p319_p9 = pnand %p318_p8, %p312_p12 }
  0x29   : > { %322 = shalt.err (!%p319_p9)
}
  0x2a   : > { %250 = dma.hbm_to_vmem [thread:$0]  (!%p470_p13), %s466_s25, 128, %s474_s27, %s88_s29  }
  0x2b   : > { %p572_p0 = scmp.lt.s32.totalorder %s389_s9, 3  ;;  %p573_p1 = scmp.ge.s32.totalorder %s389_s9, 1 }
  0x2d   : > { %p104_p3 = pnand %p573_p1, %p572_p0 }
  0x2e   : > { %s508_s21 = sand.u32 (!%p104_p3), 1, %s381_s7  }
  0x2f   : > { %107 = sbr.rel (%p104_p3) target bundleno = 244 (0xf4), region = 24  ;;  %s237_s22 = sshll.u32 (!%p104_p3), %s508_s21, 3 }
  0x30   : > { %s110_s23 = scalar_lea.sflag (!%p104_p3), [#allocation3], %s508_s21  ;;  %s113_s24 = scalar_lea.vmem (!%p104_p3), [#allocation2], %s237_s22 }
  0x36   : > { %368 = dma.done.wait (%p446_p6), %s110_s23, 128  }
  0x37   : > { %370 = vsyncadd (%p446_p6), %s110_s23, 4294967168  ;;  %v132_v0 = vld [vmem:[%s113_s24] sm:$0xff]  ;;  %s240_s25 = sshll.u32 %s424_s10, 7  ;;  %s131_s17 = scalar_lea.vmem [#allocation5], %s237_s22 }
  0x38   : > { %v133_v1 = vmul.f32 %v132_v0, %v132_v0  ;;  %s161_s26 = sshll.u32 %s131_s17, 4  ;;  %s520_s29 = scalar_lea.hbm %s565_s1, %s240_s25  ;;  %s522_s26 = int_to_ptr.vmem [resolvable:$true] %s161_s26 }
  0x39   : > { %s148_s30 = scalar_lea.sflag [#allocation4], %s508_s21  ;;  %s323_s2 = scalar_lea.vmem %s522_s26, 128 }
  0x3a   : > { %134 = vadd.xlane.f32.xlu0 %v133_v1  ;;  %p324_p6 = scmp.ne.s32.totalorder %s522_s26, %s323_s2  ;;  %p574_p11 = scmp.ne.s32.totalorder %s569_s18, 0 }
  0x3b   : > { %s392_s10 = smov [#allocation5]  }
  0x3c   : > { %p325_p12 = pnand %p324_p6, %p574_p11  ;;  %s327_s3 = sshll.u32 %s392_s10, 4  ;;  %s328_s3 = int_to_ptr.vmem [resolvable:$false] %s327_s3 }
  0x3d   : > { %s329_s4 = scalar_lea.vmem %s328_s3, 256  ;;  %p330_p7 = scmp.lt.s32.totalorder %s522_s26, %s328_s3 }
  0x3e   : > { %p326_p13 = pneg %p325_p12  ;;  %p331_p10 = scmp.lt.s32.totalorder %s329_s4, %s323_s2 }
  0x40   : > { %p332_p2 = por %p331_p10, %p330_p7 }
  0x42   : > { %p333_p4 = pnand %p332_p2, %p326_p13 }
  0xc7   : > { %v135_v2 = vpop.xlane.xlu0 %134 }
  0xc8   : > { %289 = vrsqrt.f32 %v135_v2  ;;  %vm138_vm0 = vcmp.eq.f32.partialorder %v135_v2, inf  ;;  %v141_v5 = vand.u32 2147483648, %v135_v2  ;;  %vm140_vm1 = vcmp.eq.f32.partialorder %v135_v2, 0.0 }
  0xd2   : > { %v290_v3 = vpop.eup %289 }
  0xd3   : > { %v137_v4 = vmul.f32 %v290_v3, %v135_v2 }
  0xd5   : > { %v139_v6 = vsel %vm138_vm0, %v135_v2, %v137_v4 }
  0xd6   : > { %v142_v7 = vsel %vm140_vm1, %v141_v5, %v139_v6 }
  0xd7   : > { %v143_v8 = vmax.f32 %v142_v7, 1e-12 }
  0xd9   : > { %291 = vrcp.f32 %v143_v8 }
  0xe3   : > { %v292_v9 = vpop.eup %291 }
  0xe4   : > { %v145_v10 = vmul.f32 %v292_v9, %v132_v0 }
  0xe6   : > { %146 = vst [vmem:[%s131_s17] sm:$0xff] %v145_v10 }
  0xe7   : > { %336 = shalt.err (!%p333_p4)
}
  0xe8   : > { %s337_s5 = scalar_lea.hbm %s520_s29, 128  ;;  %s341_s14 = scalar_lea.hbm %s565_s1, 256 }
  0xe9   : > { %p338_p5 = scmp.ne.s32.totalorder %s520_s29, %s337_s5  ;;  %p342_p0 = scmp.lt.u32.totalorder %s520_s29, %s565_s1 }
  0xea   : > { %p343_p1 = scmp.lt.u32.totalorder %s341_s14, %s337_s5  ;;  %p345_p6 = scmp.lt.u32.totalorder %s337_s5, %s520_s29 }
  0xeb   : > { %p339_p8 = pnand %p338_p5, %p574_p11 }
  0xec   : > { %p344_p3 = por %p343_p1, %p342_p0 }
  0xed   : > { %p340_p9 = pneg %p339_p8 }
  0xee   : > { %p346_p12 = por %p345_p6, %p344_p3 }
  0xf0   : > { %p347_p13 = pnand %p346_p12, %p340_p9 }
  0xf2   : > { %350 = shalt.err (!%p347_p13)
}
  0xf3   : > { %245 = dma.vmem_to_hbm [thread:$0]  (%p574_p11), %s522_s26, 128, %s520_s29, %s148_s30  }
  0xf4 PF: > { %s173_s21 = sand.u32 1, %s377_s6   ;;  %p575_p7 = scmp.ne.s32.totalorder %s570_s19, 0 }
  0xf5   : > { %p576_p10 = scmp.ge.s32.totalorder %s389_s9, 2  ;;  %s174_s22 = scalar_lea.sflag [#allocation4], %s173_s21 }
  0xf7   : > { %p252_p2 = pnand %p576_p10, %p575_p7 }
  0xf9   : > { %372 = dma.done.wait (!%p252_p2), %s174_s22, 128  }
  0xfa   : > { %374 = vsyncadd (!%p252_p2), %s174_s22, 4294967168  ;;  %p14_p4 = scmp.ge.s32.totalorder %s428_s12, 4   ;;  %s577_s6 = smov %s381_s7 }
  0xfb   : > { %s578_s7 = smov %s385_s8  ;;  %s579_s8 = smov %s440_s15 }
  0xfc   : > { %s580_s9 = smov %s428_s12  ;;  %16 = sbr.rel (!%p14_p4) target bundleno = 5 (0x5), region = 69 }
 0x103   :  { %179 = vsyncpa [#allocation3], 1 }
 0x104   :  { %181 = vsyncpa [#allocation3 + $0x1], 1 }
 0x105   :  { %182 = vsyncpa [#allocation4], 1 }
 0x106   :  { %184 = vsyncpa [#allocation4 + $0x1], 1 }

</bundles_post_ra>
